<compile_context>
chip_gen: v6e
topology: v6e:2x2x1
jax: 0.10.0
libtpu: 0.0.40
codegen_flags: <defaults>
</compile_context>

<pallas_src>
import functools

import jax
import jax.numpy as jnp
from jax.experimental import pallas as pl
from jax.experimental.pallas import tpu as pltpu


def _round_up(a, b):
    return (a + b - 1) // b * b


# -----------------------------------------------------------------------------
# Kernel
# -----------------------------------------------------------------------------
def vae_forward_kernel(
    x_ref,      # [TB, input_dim]              f32
    eps_ref,    # [TB, latent]                 bf16 (reparam noise)
    w1_ref,     # [input_dim, H]               bf16
    w2_ref,     # [H, H]                       bf16
    wh_ref,     # [H, head_w]  (mu|logvar|0s)  bf16, zero-padded to out_w-input_dim
    wd1_ref,    # [latent, H]                  bf16
    wd2_ref,    # [H, H]                       bf16
    wd3_ref,    # [H, input_dim]               bf16
    b_ref,      # [6, max_w]  packed biases    f32
    out_ref,    # [TB, out_w] packed outputs   bf16
):
    f32 = jnp.float32
    bf16 = jnp.bfloat16

    input_dim, hidden = w1_ref.shape
    head_w = wh_ref.shape[1]            # out_w - input_dim (zero-padded past 2*latent)
    latent = eps_ref.shape[1]

    # Packed bias rows (static slices; widths are compile-time constants).
    b1 = b_ref[0:1, :hidden]
    b2 = b_ref[1:2, :hidden]
    bh = b_ref[2:3, :head_w]
    bd1 = b_ref[3:4, :hidden]
    bd2 = b_ref[4:5, :hidden]
    bd3 = b_ref[5:6, :input_dim]

    # In-kernel cast (wrapper-side convert op removed).
    x = x_ref[...].astype(bf16)

    # Encoder: Linear -> ReLU -> Linear -> ReLU   (bf16 MXU, f32 accumulate)
    h = jnp.maximum(jnp.dot(x, w1_ref[...], preferred_element_type=f32) + b1, 0.0)
    h = jnp.maximum(
        jnp.dot(h.astype(bf16), w2_ref[...], preferred_element_type=f32) + b2, 0.0
    )

    # Fused + lane-padded latent heads: one matmul yields [mu | logvar | zeros].
    mulv = jnp.dot(h.astype(bf16), wh_ref[...], preferred_element_type=f32) + bh
    mu = mulv[:, :latent]
    logvar = mulv[:, latent : 2 * latent]

    # Reparameterize (f32): z = mu + eps * exp(0.5 * logvar)
    z = mu + eps_ref[...].astype(f32) * jnp.exp(0.5 * logvar)

    # Decoder: Linear -> ReLU -> Linear -> ReLU -> Linear
    d = jnp.maximum(
        jnp.dot(z.astype(bf16), wd1_ref[...], preferred_element_type=f32) + bd1, 0.0
    )
    d = jnp.maximum(
        jnp.dot(d.astype(bf16), wd2_ref[...], preferred_element_type=f32) + bd2, 0.0
    )
    recon = jnp.dot(d.astype(bf16), wd3_ref[...], preferred_element_type=f32) + bd3

    # Lane-dense bf16 output slab: [recon | mu | logvar | zero-pad] in one
    # unmasked full-width store; mulv already carries the lane padding.
    out_ref[...] = jnp.concatenate([recon, mulv], axis=-1).astype(out_ref.dtype)


# -----------------------------------------------------------------------------
# Param packing (call ONCE, reuse across forward calls)
# -----------------------------------------------------------------------------
def pack_params(params):
    """Fuse mu/logvar heads (zero-padded to the output-slab width), cast weights
    to bf16, and pack all 6 bias rows into a single [6, max_w] f32 array."""
    bf16 = jnp.bfloat16
    input_dim = int(params["w1"].shape[0])
    latent = int(params["wmu"].shape[1])
    out_w = _round_up(input_dim + 2 * latent, 128)   # lane-dense output slab width
    head_w = out_w - input_dim

    w_head = jnp.concatenate([params["wmu"], params["wlv"]], axis=1)
    b_head = jnp.concatenate([params["bmu"], params["blv"]], axis=1)
    # Zero-pad the fused head so the output-slab lane padding comes out of the MXU.
    w_head = jnp.pad(w_head, ((0, 0), (0, head_w - 2 * latent)))
    b_head = jnp.pad(b_head, ((0, 0), (0, head_w - 2 * latent)))

    weights = (
        params["w1"].astype(bf16),
        params["w2"].astype(bf16),
        w_head.astype(bf16),
        params["wd1"].astype(bf16),
        params["wd2"].astype(bf16),
        params["wd3"].astype(bf16),
    )
    biases = [params["b1"], params["b2"], b_head,
              params["bd1"], params["bd2"], params["bd3"]]
    max_w = max(int(b.shape[1]) for b in biases)
    bias_pack = jnp.concatenate(
        [jnp.pad(b, ((0, 0), (0, max_w - int(b.shape[1])))).astype(jnp.float32)
         for b in biases],
        axis=0,
    )
    return weights, bias_pack


# -----------------------------------------------------------------------------
# Forward wrapper (jitted; pack_params output passed in, not recomputed)
# -----------------------------------------------------------------------------
@functools.partial(jax.jit, static_argnames=("batch_block",))
def vae_forward(x, eps, weights, bias_pack, *, batch_block=2048):
    """VAE forward in one Pallas kernel.

    x:       [B, input_dim] float32
    eps:     [B, latent]    bf16 (or f32) reparameterization noise
    weights: tuple from pack_params()
    bias_pack: [6, max_w] f32 from pack_params()
    Returns (recon, mu, logvar) in float32.
    """
    B, input_dim = x.shape
    latent = eps.shape[1]
    hidden = weights[0].shape[1]
    head_w = weights[2].shape[1]
    out_w = input_dim + head_w           # lane-dense (multiple of 128)

    # --- batch tiling -------------------------------------------------------
    # Big tiles amortize the ~0.35us per-grid-step overhead; keep >= 2 steps
    # for mid/large batches so the "parallel" grid axis engages both v7x TCs.
    Bp8 = _round_up(B, 8)
    bb = max(_round_up(batch_block, 16), 16)
    n_steps = max(pl.cdiv(Bp8, bb), 2 if Bp8 >= 32 else 1)
    tb = Bp8 if n_steps == 1 else _round_up(pl.cdiv(Bp8, n_steps), 16)
    Bp = _round_up(B, tb)
    if Bp != B:
        x = jnp.pad(x, ((0, Bp - B), (0, 0)))
        eps = jnp.pad(eps, ((0, Bp - B), (0, 0)))

    const = lambda i: (0, 0)
    batched = lambda i: (i, 0)

    in_specs = (
        [
            pl.BlockSpec((tb, input_dim), batched),   # x (f32; cast in-kernel)
            pl.BlockSpec((tb, latent), batched),      # eps
        ]
        + [pl.BlockSpec(w.shape, const) for w in weights]
        + [pl.BlockSpec(bias_pack.shape, const)]
    )
    out_specs = pl.BlockSpec((tb, out_w), batched)

    flops = 2 * Bp * (
        input_dim * hidden        # enc 1
        + hidden * hidden         # enc 2
        + hidden * head_w         # fused (lane-padded) mu|logvar head
        + latent * hidden         # dec 1
        + hidden * hidden         # dec 2
        + hidden * input_dim      # dec 3
    )
    bytes_accessed = (
        Bp * input_dim * 4
        + Bp * latent * eps.dtype.itemsize
        + sum(int(w.size) * 2 for w in weights)
        + int(bias_pack.size) * 4
        + Bp * out_w * 2          # bf16 output slab
    )
    cost = pl.CostEstimate(
        flops=int(flops),
        transcendentals=int(Bp * latent),
        bytes_accessed=int(bytes_accessed),
    )

    packed_out = pl.pallas_call(
        vae_forward_kernel,
        out_shape=jax.ShapeDtypeStruct((Bp, out_w), jnp.bfloat16),
        grid=(Bp // tb,),
        in_specs=in_specs,
        out_specs=out_specs,
        compiler_params=pltpu.CompilerParams(
            dimension_semantics=("parallel",),
        ),
        cost_estimate=cost,
    )(x, eps, *weights, bias_pack)

    # Wrapper-side slice + upcast (fused into this jit's single dispatch).
    # Note: mu/logvar incur one bf16 quantization from the packed output slab.
    recon = packed_out[:B, :input_dim].astype(jnp.float32)
    mu = packed_out[:B, input_dim : input_dim + latent].astype(jnp.float32)
    logvar = packed_out[:B, input_dim + latent : input_dim + 2 * latent].astype(
        jnp.float32
    )
    return recon, mu, logvar


# -----------------------------------------------------------------------------
# Params / reference
# -----------------------------------------------------------------------------
def init_params(key, input_dim, latent_dim, hidden_size):
    """Deterministic synthetic init (PyTorch-like uniform fan-in scaling)."""
    def linear(k, fan_in, fan_out):
        kw, kb = jax.random.split(k)
        bound = 1.0 / jnp.sqrt(fan_in)
        w = jax.random.uniform(kw, (fan_in, fan_out), jnp.float32, -bound, bound)
        b = jax.random.uniform(kb, (1, fan_out), jnp.float32, -bound, bound)
        return w, b

    keys = jax.random.split(key, 7)
    p = {}
    p["w1"], p["b1"] = linear(keys[0], input_dim, hidden_size)
    p["w2"], p["b2"] = linear(keys[1], hidden_size, hidden_size)
    p["wmu"], p["bmu"] = linear(keys[2], hidden_size, latent_dim)
    p["wlv"], p["blv"] = linear(keys[3], hidden_size, latent_dim)
    p["wd1"], p["bd1"] = linear(keys[4], latent_dim, hidden_size)
    p["wd2"], p["bd2"] = linear(keys[5], hidden_size, hidden_size)
    p["wd3"], p["bd3"] = linear(keys[6], hidden_size, input_dim)
    return p


def vae_forward_ref(x, eps, p, matmul_dtype=jnp.float32):
    """Pure-JAX reference (mirrors the PyTorch module forward).

    matmul_dtype=jnp.bfloat16 mirrors the kernel's bf16-MXU / f32-accumulate
    numerics; jnp.float32 gives the full-precision reference.
    """
    def lin(a, w, b):
        return jnp.dot(
            a.astype(matmul_dtype),
            w.astype(matmul_dtype),
            preferred_element_type=jnp.float32,
        ) + b

    h = jnp.maximum(lin(x, p["w1"], p["b1"]), 0.0)
    h = jnp.maximum(lin(h, p["w2"], p["b2"]), 0.0)
    mu = lin(h, p["wmu"], p["bmu"])
    logvar = lin(h, p["wlv"], p["blv"])
    z = mu + eps * jnp.exp(0.5 * logvar)
    d = jnp.maximum(lin(z, p["wd1"], p["bd1"]), 0.0)
    d = jnp.maximum(lin(d, p["wd2"], p["bd2"]), 0.0)
    recon = lin(d, p["wd3"], p["bd3"])
    return recon, mu, logvar


# -----------------------------------------------------------------------------
# Demo / test
# -----------------------------------------------------------------------------
if __name__ == "__main__":
    # Small shapes; B=8 keeps the sublane (8) fully occupied.
    B, input_dim, latent_dim, hidden_size = 8, 16, 8, 32

    key = jax.random.PRNGKey(0)
    k_params, k_x, k_eps = jax.random.split(key, 3)

    params = init_params(k_params, input_dim, latent_dim, hidden_size)
    x = jax.random.normal(k_x, (B, input_dim), jnp.float32)
    # eps is the reparameterization noise (torch.randn_like(std)), made explicit
    # and deterministic here; generated/stored in bf16 (pure noise -> harmless)
    # so its DMA halves.
    eps = jax.random.normal(k_eps, (B, latent_dim), jnp.float32).astype(jnp.bfloat16)

    # Pack/fuse/cast params ONCE; the pallas_call is the only per-forward device op.
    weights, bias_pack = pack_params(params)

    recon, mu, logvar = vae_forward(x, eps, weights, bias_pack)
    jax.block_until_ready((recon, mu, logvar))

    # Tight check against a reference mirroring the kernel's numerics
    # (bf16 MXU matmuls, same bf16 eps, bf16-quantized output slab).
    eps32 = eps.astype(jnp.float32)
    recon_b, mu_b, logvar_b = vae_forward_ref(x, eps32, params, jnp.bfloat16)
    to_bf = lambda a: a.astype(jnp.bfloat16).astype(jnp.float32)
    assert jnp.allclose(recon, to_bf(recon_b), atol=2e-2, rtol=2e-2)
    assert jnp.allclose(mu, to_bf(mu_b), atol=2e-2, rtol=2e-2)
    assert jnp.allclose(logvar, to_bf(logvar_b), atol=2e-2, rtol=2e-2)

    # Loose check against the full-f32 reference (bf16 MXU inputs/output slab).
    recon_r, mu_r, logvar_r = vae_forward_ref(x, eps32, params, jnp.float32)
    assert jnp.allclose(recon, recon_r, atol=1e-1, rtol=1e-1)
    assert jnp.allclose(mu, mu_r, atol=1e-1, rtol=1e-1)
    assert jnp.allclose(logvar, logvar_r, atol=1e-1, rtol=1e-1)

    print("KERNEL_OK")
</pallas_src>

<mosaic_0001>
module attributes {stable_mosaic.version = 11 : i64} {
  func.func @vae_forward_kernel(%arg0: i32, %arg1: memref<8x16xf32, #tpu.memory_space<vmem>>, %arg2: memref<8x8xbf16, #tpu.memory_space<vmem>>, %arg3: memref<16x32xbf16, #tpu.memory_space<vmem>>, %arg4: memref<32x32xbf16, #tpu.memory_space<vmem>>, %arg5: memref<32x112xbf16, #tpu.memory_space<vmem>>, %arg6: memref<8x32xbf16, #tpu.memory_space<vmem>>, %arg7: memref<32x32xbf16, #tpu.memory_space<vmem>>, %arg8: memref<32x16xbf16, #tpu.memory_space<vmem>>, %arg9: memref<6x112xf32, #tpu.memory_space<vmem>>, %arg10: memref<8x128xbf16, #tpu.memory_space<vmem>>) attributes {dimension_semantics = [#tpu.dimension_semantics<parallel>], iteration_bounds = array<i64: 1>, scalar_prefetch = 0 : i64, scratch_operands = 0 : i64, tpu.core_type = #tpu.core_type<tc>, window_params = [{transform_indices = @transform_0, window_bounds = array<i64: 8, 16>}, {transform_indices = @transform_1, window_bounds = array<i64: 8, 8>}, {pipeline_mode = #tpu.pipeline_mode<synchronous>, transform_indices = @transform_2, window_bounds = array<i64: 16, 32>}, {pipeline_mode = #tpu.pipeline_mode<synchronous>, transform_indices = @transform_3, window_bounds = array<i64: 32, 32>}, {pipeline_mode = #tpu.pipeline_mode<synchronous>, transform_indices = @transform_4, window_bounds = array<i64: 32, 112>}, {pipeline_mode = #tpu.pipeline_mode<synchronous>, transform_indices = @transform_5, window_bounds = array<i64: 8, 32>}, {pipeline_mode = #tpu.pipeline_mode<synchronous>, transform_indices = @transform_6, window_bounds = array<i64: 32, 32>}, {pipeline_mode = #tpu.pipeline_mode<synchronous>, transform_indices = @transform_7, window_bounds = array<i64: 32, 16>}, {pipeline_mode = #tpu.pipeline_mode<synchronous>, transform_indices = @transform_8, window_bounds = array<i64: 6, 112>}, {transform_indices = @transform_9, window_bounds = array<i64: 8, 128>}]} {
    %c0 = arith.constant 0 : index
    %c0_0 = arith.constant 0 : index
    %0 = vector.load %arg9[%c0, %c0_0] : memref<6x112xf32, #tpu.memory_space<vmem>>, vector<1x32xf32>
    %c1 = arith.constant 1 : index
    %c0_1 = arith.constant 0 : index
    %1 = vector.load %arg9[%c1, %c0_1] : memref<6x112xf32, #tpu.memory_space<vmem>>, vector<1x32xf32>
    %c2 = arith.constant 2 : index
    %c0_2 = arith.constant 0 : index
    %2 = vector.load %arg9[%c2, %c0_2] : memref<6x112xf32, #tpu.memory_space<vmem>>, vector<1x112xf32>
    %c3 = arith.constant 3 : index
    %c0_3 = arith.constant 0 : index
    %3 = vector.load %arg9[%c3, %c0_3] : memref<6x112xf32, #tpu.memory_space<vmem>>, vector<1x32xf32>
    %c4 = arith.constant 4 : index
    %c0_4 = arith.constant 0 : index
    %4 = vector.load %arg9[%c4, %c0_4] : memref<6x112xf32, #tpu.memory_space<vmem>>, vector<1x32xf32>
    %c5 = arith.constant 5 : index
    %c0_5 = arith.constant 0 : index
    %5 = vector.load %arg9[%c5, %c0_5] : memref<6x112xf32, #tpu.memory_space<vmem>>, vector<1x16xf32>
    %c0_6 = arith.constant 0 : index
    %c0_7 = arith.constant 0 : index
    %6 = vector.load %arg1[%c0_6, %c0_7] : memref<8x16xf32, #tpu.memory_space<vmem>>, vector<8x16xf32>
    %7 = arith.truncf %6 : vector<8x16xf32> to vector<8x16xbf16>
    %c0_8 = arith.constant 0 : index
    %c0_9 = arith.constant 0 : index
    %8 = vector.load %arg3[%c0_8, %c0_9] : memref<16x32xbf16, #tpu.memory_space<vmem>>, vector<16x32xbf16>
    %cst = arith.constant dense<0.000000e+00> : vector<8x32xf32>
    %9 = tpu.matmul %7, %8, %cst {dimension_numbers = #tpu.dot_dimension_numbers<[1], [0], [0], [1], [0, 0, 1, 1], [], []>} : vector<8x16xbf16>, vector<16x32xbf16>, vector<8x32xf32> -> vector<8x32xf32>
    %10 = vector.broadcast %0 : vector<1x32xf32> to vector<8x32xf32>
    %11 = arith.addf %9, %10 : vector<8x32xf32>
    %cst_10 = arith.constant 0.000000e+00 : f32
    %12 = vector.broadcast %cst_10 : f32 to vector<8x32xf32>
    %13 = arith.maximumf %11, %12 : vector<8x32xf32>
    %14 = arith.truncf %13 : vector<8x32xf32> to vector<8x32xbf16>
    %c0_11 = arith.constant 0 : index
    %c0_12 = arith.constant 0 : index
    %15 = vector.load %arg4[%c0_11, %c0_12] : memref<32x32xbf16, #tpu.memory_space<vmem>>, vector<32x32xbf16>
    %cst_13 = arith.constant dense<0.000000e+00> : vector<8x32xf32>
    %16 = tpu.matmul %14, %15, %cst_13 {dimension_numbers = #tpu.dot_dimension_numbers<[1], [0], [0], [1], [0, 0, 1, 1], [], []>} : vector<8x32xbf16>, vector<32x32xbf16>, vector<8x32xf32> -> vector<8x32xf32>
    %17 = vector.broadcast %1 : vector<1x32xf32> to vector<8x32xf32>
    %18 = arith.addf %16, %17 : vector<8x32xf32>
    %cst_14 = arith.constant 0.000000e+00 : f32
    %19 = vector.broadcast %cst_14 : f32 to vector<8x32xf32>
    %20 = arith.maximumf %18, %19 : vector<8x32xf32>
    %21 = arith.truncf %20 : vector<8x32xf32> to vector<8x32xbf16>
    %c0_15 = arith.constant 0 : index
    %c0_16 = arith.constant 0 : index
    %22 = vector.load %arg5[%c0_15, %c0_16] : memref<32x112xbf16, #tpu.memory_space<vmem>>, vector<32x112xbf16>
    %cst_17 = arith.constant dense<0.000000e+00> : vector<8x112xf32>
    %23 = tpu.matmul %21, %22, %cst_17 {dimension_numbers = #tpu.dot_dimension_numbers<[1], [0], [0], [1], [0, 0, 1, 1], [], []>} : vector<8x32xbf16>, vector<32x112xbf16>, vector<8x112xf32> -> vector<8x112xf32>
    %24 = vector.broadcast %2 : vector<1x112xf32> to vector<8x112xf32>
    %25 = arith.addf %23, %24 : vector<8x112xf32>
    %26 = vector.extract_strided_slice %25 {offsets = [0, 0], sizes = [8, 8], strides = [1, 1]} : vector<8x112xf32> to vector<8x8xf32>
    %27 = vector.extract_strided_slice %25 {offsets = [0, 8], sizes = [8, 8], strides = [1, 1]} : vector<8x112xf32> to vector<8x8xf32>
    %c0_18 = arith.constant 0 : index
    %c0_19 = arith.constant 0 : index
    %28 = vector.load %arg2[%c0_18, %c0_19] : memref<8x8xbf16, #tpu.memory_space<vmem>>, vector<8x8xbf16>
    %29 = arith.extf %28 : vector<8x8xbf16> to vector<8x8xf32>
    %cst_20 = arith.constant 5.000000e-01 : f32
    %30 = vector.broadcast %cst_20 : f32 to vector<8x8xf32>
    %31 = arith.mulf %30, %27 : vector<8x8xf32>
    %32 = math.exp %31 : vector<8x8xf32>
    %33 = arith.mulf %29, %32 : vector<8x8xf32>
    %34 = arith.addf %26, %33 : vector<8x8xf32>
    %35 = arith.truncf %34 : vector<8x8xf32> to vector<8x8xbf16>
    %c0_21 = arith.constant 0 : index
    %c0_22 = arith.constant 0 : index
    %36 = vector.load %arg6[%c0_21, %c0_22] : memref<8x32xbf16, #tpu.memory_space<vmem>>, vector<8x32xbf16>
    %cst_23 = arith.constant dense<0.000000e+00> : vector<8x32xf32>
    %37 = tpu.matmul %35, %36, %cst_23 {dimension_numbers = #tpu.dot_dimension_numbers<[1], [0], [0], [1], [0, 0, 1, 1], [], []>} : vector<8x8xbf16>, vector<8x32xbf16>, vector<8x32xf32> -> vector<8x32xf32>
    %38 = vector.broadcast %3 : vector<1x32xf32> to vector<8x32xf32>
    %39 = arith.addf %37, %38 : vector<8x32xf32>
    %cst_24 = arith.constant 0.000000e+00 : f32
    %40 = vector.broadcast %cst_24 : f32 to vector<8x32xf32>
    %41 = arith.maximumf %39, %40 : vector<8x32xf32>
    %42 = arith.truncf %41 : vector<8x32xf32> to vector<8x32xbf16>
    %c0_25 = arith.constant 0 : index
    %c0_26 = arith.constant 0 : index
    %43 = vector.load %arg7[%c0_25, %c0_26] : memref<32x32xbf16, #tpu.memory_space<vmem>>, vector<32x32xbf16>
    %cst_27 = arith.constant dense<0.000000e+00> : vector<8x32xf32>
    %44 = tpu.matmul %42, %43, %cst_27 {dimension_numbers = #tpu.dot_dimension_numbers<[1], [0], [0], [1], [0, 0, 1, 1], [], []>} : vector<8x32xbf16>, vector<32x32xbf16>, vector<8x32xf32> -> vector<8x32xf32>
    %45 = vector.broadcast %4 : vector<1x32xf32> to vector<8x32xf32>
    %46 = arith.addf %44, %45 : vector<8x32xf32>
    %cst_28 = arith.constant 0.000000e+00 : f32
    %47 = vector.broadcast %cst_28 : f32 to vector<8x32xf32>
    %48 = arith.maximumf %46, %47 : vector<8x32xf32>
    %49 = arith.truncf %48 : vector<8x32xf32> to vector<8x32xbf16>
    %c0_29 = arith.constant 0 : index
    %c0_30 = arith.constant 0 : index
    %50 = vector.load %arg8[%c0_29, %c0_30] : memref<32x16xbf16, #tpu.memory_space<vmem>>, vector<32x16xbf16>
    %cst_31 = arith.constant dense<0.000000e+00> : vector<8x16xf32>
    %51 = tpu.matmul %49, %50, %cst_31 {dimension_numbers = #tpu.dot_dimension_numbers<[1], [0], [0], [1], [0, 0, 1, 1], [], []>} : vector<8x32xbf16>, vector<32x16xbf16>, vector<8x16xf32> -> vector<8x16xf32>
    %52 = vector.broadcast %5 : vector<1x16xf32> to vector<8x16xf32>
    %53 = arith.addf %51, %52 : vector<8x16xf32>
    %54 = tpu.concatenate %53, %25 in 1 : vector<8x16xf32>, vector<8x112xf32> -> vector<8x128xf32>
    %55 = arith.truncf %54 : vector<8x128xf32> to vector<8x128xbf16>
    %c0_32 = arith.constant 0 : index
    %c0_33 = arith.constant 0 : index
    %56 = vector.load %arg10[%c0_32, %c0_33] : memref<8x128xbf16, #tpu.memory_space<vmem>>, vector<8x128xbf16>
    tpu.vector_store %arg10[%c0_32, %c0_33], %55 {strides = array<i32>} : memref<8x128xbf16, #tpu.memory_space<vmem>>, vector<8x128xbf16>,
    return
  }
  func.func @transform_0(%arg0: i32) -> (i32, i32) {
    %c0_i32 = arith.constant 0 : i32
    %c0_i32_0 = arith.constant 0 : i32
    return %arg0, %c0_i32 : i32, i32
  }
  func.func @transform_1(%arg0: i32) -> (i32, i32) {
    %c0_i32 = arith.constant 0 : i32
    %c0_i32_0 = arith.constant 0 : i32
    return %arg0, %c0_i32 : i32, i32
  }
  func.func @transform_2(%arg0: i32) -> (i32, i32) {
    %c0_i32 = arith.constant 0 : i32
    %c0_i32_0 = arith.constant 0 : i32
    %c0_i32_1 = arith.constant 0 : i32
    return %c0_i32, %c0_i32_0 : i32, i32
  }
  func.func @transform_3(%arg0: i32) -> (i32, i32) {
    %c0_i32 = arith.constant 0 : i32
    %c0_i32_0 = arith.constant 0 : i32
    %c0_i32_1 = arith.constant 0 : i32
    return %c0_i32, %c0_i32_0 : i32, i32
  }
  func.func @transform_4(%arg0: i32) -> (i32, i32) {
    %c0_i32 = arith.constant 0 : i32
    %c0_i32_0 = arith.constant 0 : i32
    %c0_i32_1 = arith.constant 0 : i32
    return %c0_i32, %c0_i32_0 : i32, i32
  }
  func.func @transform_5(%arg0: i32) -> (i32, i32) {
    %c0_i32 = arith.constant 0 : i32
    %c0_i32_0 = arith.constant 0 : i32
    %c0_i32_1 = arith.constant 0 : i32
    return %c0_i32, %c0_i32_0 : i32, i32
  }
  func.func @transform_6(%arg0: i32) -> (i32, i32) {
    %c0_i32 = arith.constant 0 : i32
    %c0_i32_0 = arith.constant 0 : i32
    %c0_i32_1 = arith.constant 0 : i32
    return %c0_i32, %c0_i32_0 : i32, i32
  }
  func.func @transform_7(%arg0: i32) -> (i32, i32) {
    %c0_i32 = arith.constant 0 : i32
    %c0_i32_0 = arith.constant 0 : i32
    %c0_i32_1 = arith.constant 0 : i32
    return %c0_i32, %c0_i32_0 : i32, i32
  }
  func.func @transform_8(%arg0: i32) -> (i32, i32) {
    %c0_i32 = arith.constant 0 : i32
    %c0_i32_0 = arith.constant 0 : i32
    %c0_i32_1 = arith.constant 0 : i32
    return %c0_i32, %c0_i32_0 : i32, i32
  }
  func.func @transform_9(%arg0: i32) -> (i32, i32) {
    %c0_i32 = arith.constant 0 : i32
    %c0_i32_0 = arith.constant 0 : i32
    return %arg0, %c0_i32 : i32, i32
  }
}

</mosaic_0001>

<bundles_post_ra>
// kernel: vae_forward.1
= control target key start
LH: loop header
LB: loop body
LE: loop exit
PB: predicated region body
PF: predicated region fallthrough
CT: control target
= control target key end

     0   :  { %14 = vsyncpa [#allocation3], 0  ;;  %s833_s0 = inlined_call_operand.vmem [shape: f32[8,16], index: 0, kind: input, shape index: {}]   ;;  %s834_s1 = inlined_call_operand.hbm [shape: bf16[8,8], index: 1, kind: input, shape index: {}]   ;;  %s835_s2 = inlined_call_operand.vmem [shape: bf16[16,32], index: 2, kind: input, shape index: {}]   ;;  %s836_s3 = inlined_call_operand.vmem [shape: bf16[32,32], index: 3, kind: input, shape index: {}]   ;;  %s837_s4 = inlined_call_operand.hbm [shape: bf16[32,112], index: 4, kind: input, shape index: {}]   ;;  %s838_s5 = inlined_call_operand.hbm [shape: bf16[8,32], index: 5, kind: input, shape index: {}]   ;;  %s839_s6 = inlined_call_operand.hbm [shape: bf16[32,32], index: 6, kind: input, shape index: {}]   ;;  %s840_s7 = inlined_call_operand.vmem [shape: bf16[32,16], index: 7, kind: input, shape index: {}]   ;;  %s841_s8 = inlined_call_operand.hbm [shape: f32[6,112], index: 8, kind: input, shape index: {}]   ;;  %s842_s9 = inlined_call_operand.vmem [shape: bf16[8,128], index: 9, kind: output, shape index: {}]  }
   0x1   :  { %15 = vsyncpa [#allocation5], 0 }
   0x2   :  { %16 = vsyncpa [#allocation8], 0  ;;  %s708_s30 = smov [#allocation4]  }
   0x3   :  { %s38_s10 = sshll.u32 %s708_s30, 4  ;;  %s39_s10 = int_to_ptr.vmem [resolvable:$true] %s38_s10 }
   0x4   :  { %s610_s11 = scalar_lea.vmem %s39_s10, 256  ;;  %p615_p1 = scmp.lt.s32.totalorder %s39_s10, %s39_s10 }
   0x5   :  { %p611_p0 = scmp.ne.s32.totalorder %s39_s10, %s610_s11  ;;  %p616_p2 = scmp.lt.s32.totalorder %s610_s11, %s610_s11 }
   0x7   :  { %p617_p3 = por %p616_p2, %p615_p1 }
   0x9   :  { %p618_p4 = pnand %p617_p3, %p611_p0 }
   0xb   :  { %621 = shalt.err (!%p618_p4)
}
   0xc   :  { %s709_s12 = smov 64   ;;  %s710_s13 = smov 4  }
   0xd   :  { %44 = dma.hbm_to_vmem [thread:$0]  %s837_s4, 256, %s39_s10, [#allocation5], %s709_s12, %s709_s12, %s710_s13  }
   0xe   :  { %s711_s16 = smov [#allocation7]   ;;  %s712_s18 = smov [#allocation2]  }
   0xf   :  { %s60_s17 = sshll.u32 %s711_s16, 4  ;;  %s25_s19 = sshll.u32 %s712_s18, 4  ;;  %s61_s17 = int_to_ptr.vmem [resolvable:$true] %s60_s17  ;;  %s26_s19 = int_to_ptr.vmem [resolvable:$true] %s25_s19 }
  0x10   :  { %s630_s20 = scalar_lea.vmem %s61_s17, 256  ;;  %p635_p6 = scmp.lt.s32.totalorder %s61_s17, %s61_s17 }
  0x11   :  { %p631_p5 = scmp.ne.s32.totalorder %s61_s17, %s630_s20  ;;  %p636_p7 = scmp.lt.s32.totalorder %s630_s20, %s630_s20 }
  0x13   :  { %p637_p8 = por %p636_p7, %p635_p6 }
  0x15   :  { %p638_p9 = pnand %p637_p8, %p631_p5 }
  0x17   :  { %641 = shalt.err (!%p638_p9)
}
  0x18   :  { %66 = dma.hbm_to_vmem [thread:$0]  %s839_s6, 256, %s61_s17, [#allocation8], %s709_s12, %s709_s12, %s710_s13  }
  0x19   :  { %s650_s23 = scalar_lea.vmem %s26_s19, 64  ;;  %p655_p11 = scmp.lt.s32.totalorder %s26_s19, %s26_s19 }
  0x1a   :  { %p651_p10 = scmp.ne.s32.totalorder %s26_s19, %s650_s23  ;;  %p656_p12 = scmp.lt.s32.totalorder %s650_s23, %s650_s23 }
  0x1c   :  { %p657_p13 = por %p656_p12, %p655_p11 }
  0x1e   :  { %p658_p0 = pnand %p657_p13, %p651_p10 }
  0x20   :  { %661 = shalt.err (!%p658_p0)
}
  0x21   :  { %28 = dma.hbm_to_vmem [thread:$0]  %s834_s1, 64, %s26_s19, [#allocation3]  }
  0x22   :  { %s713_s25 = smov [#allocation6]   ;;  %s714_s27 = smov [#allocation9]  }
  0x23   :  { %s51_s26 = sshll.u32 %s713_s25, 4  ;;  %s75_s28 = sshll.u32 %s714_s27, 4  ;;  %s52_s26 = int_to_ptr.vmem [resolvable:$true] %s51_s26  ;;  %s76_s28 = int_to_ptr.vmem [resolvable:$true] %s75_s28 }
  0x24   :  { %s670_s29 = scalar_lea.vmem %s52_s26, 64  ;;  %p675_p2 = scmp.lt.s32.totalorder %s52_s26, %s52_s26 }
  0x25   :  { %p671_p1 = scmp.ne.s32.totalorder %s52_s26, %s670_s29  ;;  %p676_p3 = scmp.lt.s32.totalorder %s670_s29, %s670_s29 }
  0x27   :  { %p677_p4 = por %p676_p3, %p675_p2 }
  0x29   :  { %p678_p5 = pnand %p677_p4, %p671_p1 }
  0x2b   :  { %681 = shalt.err (!%p678_p5)
}
  0x2c   :  { %54 = dma.hbm_to_vmem [thread:$0]  %s838_s5, 64, %s52_s26, [#allocation5]  }
  0x2d   :  { %s690_s10 = scalar_lea.vmem %s76_s28, 128  ;;  %p695_p7 = scmp.lt.s32.totalorder %s76_s28, %s76_s28 }
  0x2e   :  { %p691_p6 = scmp.ne.s32.totalorder %s76_s28, %s690_s10  ;;  %p696_p8 = scmp.lt.s32.totalorder %s690_s10, %s690_s10 }
  0x30   :  { %p697_p9 = por %p696_p8, %p695_p7 }
  0x32   :  { %p698_p10 = pnand %p697_p9, %p691_p6 }
  0x34   :  { %701 = shalt.err (!%p698_p10)
}
  0x35   :  { %78 = dma.hbm_to_vmem [thread:$0]  %s841_s8, 128, %s76_s28, [#allocation8]  }
  0x36   :  { %702 = dma.done.wait [#allocation3], 64  }
  0x37   :  { %703 = vsyncadd [#allocation3], 4294967232 }
  0x38   :  { %704 = dma.done.wait [#allocation5], 320  }
  0x39   :  { %705 = vsyncadd [#allocation5], 4294966976 }
  0x3a   :  { %706 = dma.done.wait [#allocation8], 384  }
  0x3b   :  { %707 = vsyncadd [#allocation8], 4294966912  ;;  %v715_v0 = vmov 0.0   ;;  %vm716_vm0 = vmmov 0   ;;  %v591_v1 = vld [vmem:[%s835_s2] sm:$0xff]   ;;  %vm115_vm1 = vcmask 130048  }
  0x3c   :  { %536 = vmatprep.subr.bf16.mxu0 %v715_v0  ;;  %538 = vmatprep.mubr.msk.bf16.mxu0 %vm716_vm0, %v715_v0  ;;  %v101_v2 = vld [vmem:[%s833_s0] sm:$0xff]  ;;  %v592_v4 = vld [vmem:[%s836_s3 + $0x8] sm:$0xff]   ;;  %vm181_vm2 = vcmask 261120   ;;  %v302_v24 = vld [vmem:[#allocation6] sm:$0xf]  ;;  %vm311_vm3 = vcmask 1043456  }
  0x3d   :  { %542 = vmatprep.subr.bf16.mxu1 %v715_v0  ;;  %546 = vmatprep.mubr.msk.bf16.mxu1 %vm716_vm0, %v715_v0  ;;  %v102_v3 = vpack.c.bf16 %v101_v2, %v101_v2  ;;  %v593_v5 = vld [vmem:[%s836_s3] sm:$0xff]   ;;  %v594_v6 = vld [vmem:[#allocation4 + $0x8] sm:$0xff]   ;;  %v499_v7 = vld [vmem:[#allocation9] ss:$0 sm:$0xff]  ;;  %v313_v25 = vsel %vm311_vm3, %v302_v24, 0  ;;  %s717_s0 = smov 120  }
  0x3e   :  { %537 = vmatpush3.bf16.msra.mxu0 %v591_v1  ;;  %543 = vmatpush3.bf16.msra.mxu1 %v592_v4  ;;  %v595_v15 = vld [vmem:[#allocation4] sm:$0xff]   ;;  %s718_s3 = smov 16   ;;  %v290_v36 = vld [vmem:[#allocation2] sm:$0xf]  ;;  %vm307_vm4 = vcmask 64512   ;;  %v597_v42 = vld [vmem:[#allocation7] sm:$0xff]  }
  0x3f   :  { %550 = vmatprep.subr.bf16.mxu0 %v715_v0  ;;  %544 = vmatprep.subr.bf16.mxu1 %v715_v0  ;;  %v502_v16 = vld [vmem:[#allocation9 + $0x1] ss:$0 sm:$0xff]  ;;  %v506_v26 = vld [vmem:[#allocation9 + $0x2] ss:$0 sm:$0xff]  ;;  %v596_v34 = vld [vmem:[#allocation7 + $0x8] sm:$0xff]   ;;  %v291_v37 = vunpack.c.l.bf16 %v290_v36 }
  0x40   :  { %v598_v43 = vld [vmem:[%s840_s7 + $0x8] sm:$0xff]   ;;  %v599_v52 = vld [vmem:[%s840_s7] sm:$0xff]  }
  0x41   :  { %539 = vmatmul.mubr.msk.bf16.vlgmr.msra.gmra.mxu0 %vm115_vm1, %v102_v3  ;;  %v510_v44 = vld [vmem:[#allocation9 + $0x3] ss:$0 sm:$0xff]  ;;  %v512_v53 = vld [vmem:[#allocation9 + $0x4] ss:$0 sm:$0xff]  ;;  %v516_v61 = vld [vmem:[#allocation9 + $0x5] ss:$0 sm:$0xff] }
  0x42   :  { %554 = vmatprep.mubr.msk.bf16.mxu0 %vm716_vm0, %v715_v0  ;;  %545 = vmatpush3.bf16.msra.mxu1 %v593_v5 }
  0x43   :  { %558 = vmatprep.subr.bf16.mxu1 %v715_v0  ;;  %551 = vmatpush3.bf16.msra.mxu0 %v594_v6 }
  0x44   :  { %552 = vmatprep.subr.bf16.mxu0 %v715_v0 }
  0x47   :  { %553 = vmatpush3.bf16.msra.mxu0 %v595_v15 }
  0x48   :  { %564 = vmatprep.subr.bf16.mxu0 %v715_v0 }
 0x101   :  { %v153_v8 = vpop.f32.mrf.mxu0 }
 0x102   :  { %v154_v9 = vadd.f32 %v499_v7, %v153_v8 }
 0x103   :  { %v540_v10 = vpop.f32.mrf.mxu0 }
 0x104   :  { %v159_v11 = vmax.f32 %v154_v9, 0.0 }
 0x105   :  { %v156_v12 = vpop.f32.mrf.mxu0 }
 0x106   :  { %v160_v13 = vpack.c.bf16 %v159_v11, %v159_v11 }
 0x107   :  { %v541_v14 = vpop.f32.mrf.mxu0 }
 0x108   :  { %547 = vmatmul.mubr.msk.bf16.vlgmr.msra.gmra.mxu1 %vm181_vm2, %v160_v13 }
 0x109   :  { %560 = vmatprep.mubr.msk.bf16.mxu1 %vm716_vm0, %v715_v0  ;;  %559 = vmatpush3.bf16.msra.mxu1 %v313_v25 }
 0x10a   :  { %572 = vmatprep.subr.bf16.mxu1 %v715_v0 }
 0x1c8   :  { %v219_v17 = vpop.f32.mrf.mxu1 }
 0x1c9   :  { %v220_v18 = vadd.f32 %v502_v16, %v219_v17 }
 0x1ca   :  { %v548_v19 = vpop.f32.mrf.mxu1 }
 0x1cb   :  { %v225_v20 = vmax.f32 %v220_v18, 0.0 }
 0x1cc   :  { %v222_v21 = vpop.f32.mrf.mxu1 }
 0x1cd   :  { %v226_v22 = vpack.c.bf16 %v225_v20, %v225_v20 }
 0x1ce   :  { %v549_v23 = vpop.f32.mrf.mxu1 }
 0x1cf   :  { %555 = vmatmul.mubr.msk.bf16.vlgmr.msra.gmra.mxu0 %vm181_vm2, %v226_v22 }
 0x1d0   :  { %568 = vmatprep.mubr.msk.bf16.mxu0 %vm716_vm0, %v715_v0  ;;  %565 = vmatpush3.bf16.msra.mxu0 %v596_v34 }
 0x1d1   :  { %566 = vmatprep.subr.bf16.mxu0 %v715_v0 }
 0x1d4   :  { %567 = vmatpush3.bf16.msra.mxu0 %v597_v42 }
 0x28f   :  { %v284_v27 = vpop.f32.mrf.mxu0 }
 0x290   :  { %v285_v28 = vadd.f32 %v506_v26, %v284_v27 }
 0x291   :  { %v556_v29 = vpop.f32.mrf.mxu0 }
 0x292   :  { %v292_v30 = vmul.f32 0.5, %v285_v28 }
 0x293   :  { %v287_v31 = vpop.f32.mrf.mxu0 }
 0x294   :  { %v293_v32 = vmul.f32 1.442695, %v292_v30 }
 0x295   :  { %v557_v33 = vpop.f32.mrf.mxu0 }
 0x296   :  { %600 = vpow2.f32 %v293_v32 }
 0x2a3   :  { %v601_v35 = vpop.eup %600 }
 0x2a4   :  { %296 = vrot.lane.b32.xlu0 %v601_v35, %s717_s0 }
 0x2a8   :  { %486 = vrot.lane.b32.xlu0 %v285_v28, %s718_s3 }
 0x316   :  { %v297_v38 = vpop.permute.xlu0 %296 }
 0x317   :  { %v299_v39 = vmul.f32 %v297_v38, %v291_v37 }
 0x319   :  { %v300_v40 = vadd.f32 %v299_v39, %v285_v28 }
 0x31b   :  { %v301_v41 = vpack.c.bf16 %v300_v40, %v300_v40 }
 0x31d   :  { %561 = vmatmul.mubr.msk.bf16.vlgmr.msra.gmra.mxu1 %vm307_vm4, %v301_v41 }
 0x31e   :  { %576 = vmatprep.mubr.msk.bf16.mxu1 %vm716_vm0, %v715_v0  ;;  %573 = vmatpush3.bf16.msra.mxu1 %v598_v43 }
 0x31f   :  { %574 = vmatprep.subr.bf16.mxu1 %v715_v0  ;;  %v487_v0 = vpop.permute.xlu0 %486 }
 0x322   :  { %575 = vmatpush3.bf16.msra.mxu1 %v599_v52 }
 0x3dd   :  { %v349_v45 = vpop.f32.mrf.mxu1 }
 0x3de   :  { %v350_v46 = vadd.f32 %v510_v44, %v349_v45 }
 0x3df   :  { %v562_v47 = vpop.f32.mrf.mxu1 }
 0x3e0   :  { %v355_v48 = vmax.f32 %v350_v46, 0.0 }
 0x3e1   :  { %v352_v49 = vpop.f32.mrf.mxu1 }
 0x3e2   :  { %v356_v50 = vpack.c.bf16 %v355_v48, %v355_v48 }
 0x3e3   :  { %v563_v51 = vpop.f32.mrf.mxu1 }
 0x3e4   :  { %569 = vmatmul.mubr.msk.bf16.vlgmr.msra.gmra.mxu0 %vm181_vm2, %v356_v50 }
 0x4a4   :  { %v414_v54 = vpop.f32.mrf.mxu0 }
 0x4a5   :  { %v415_v55 = vadd.f32 %v512_v53, %v414_v54 }
 0x4a6   :  { %v570_v56 = vpop.f32.mrf.mxu0 }
 0x4a7   :  { %v420_v57 = vmax.f32 %v415_v55, 0.0 }
 0x4a8   :  { %v417_v58 = vpop.f32.mrf.mxu0 }
 0x4a9   :  { %v421_v59 = vpack.c.bf16 %v420_v57, %v420_v57 }
 0x4aa   :  { %v571_v60 = vpop.f32.mrf.mxu0 }
 0x4ab   :  { %577 = vmatmul.mubr.msk.bf16.vlgmr.msra.gmra.mxu1 %vm181_vm2, %v421_v59 }
 0x56b   :  { %v479_v62 = vpop.f32.mrf.mxu1 }
 0x56c   :  { %v480_v63 = vadd.f32 %v516_v61, %v479_v62 }
 0x56d   :  { %v578_v1 = vpop.f32.mrf.mxu1 }
 0x56e   :  { %v489_v2 = vsel %vm115_vm1, %v480_v63, %v487_v0 }
 0x56f   :  { %v490_v3 = vpack.c.bf16 %v489_v2, %v489_v2  ;;  %v482_v4 = vpop.f32.mrf.mxu1 }
 0x571   :  { %491 = vst [vmem:[%s842_s9] sm:$0xf] %v490_v3  ;;  %v579_v5 = vpop.f32.mrf.mxu1 }
 0x572   :  { %496 = vsyncpa [#allocation3], 1 }
 0x573   :  { %497 = vsyncpa [#allocation5], 1 }
 0x574   :  { %498 = vsyncpa [#allocation8], 1 }

</bundles_post_ra>
